<compile_context>
chip_gen: v5e
topology: v5e:2x2
jax: 0.10.0
libtpu: 0.0.40
codegen_flags: <defaults>
</compile_context>

<pallas_src>
import jax
import jax.numpy as jnp
from jax import lax
from jax.experimental import pallas as pl
from jax.experimental.pallas import tpu as pltpu

H, W = 49, 89            # original input spatial dims
H2, W2 = H + 2, W + 2    # after conv1 (1x1, padding=1): 51, 91 (== conv2 output)
H3, W3 = H2 + 2, W2 + 2  # after conv3 (1x1, padding=1): 53, 93
CH, CW = 56, 128         # (8,128)-aligned VMEM canvas

# --- static checks tying the canvas to the geometry/zero-ring invariant -------------
assert CH % 8 == 0 and CW % 128 == 0, "canvas must be (8,128)-aligned"
assert H2 == H + 2 and W2 == W + 2 and H3 == H + 4 and W3 == W + 4
# at least one guaranteed-zero row/col beyond the x2/x4 footprint (rows [1,1+H2),
# cols [1,1+W2)) so +/-1 roll wraparound only brings zeros; output window must fit.
assert 1 + H2 < CH and 1 + W2 < CW
assert H3 <= CH and W3 <= CW


def _model_tanh_kernel(x_ref, s_ref, o_ref, canvas_ref):
    # x_ref:      (H, W)   f32 raw input plane (VMEM), one plane per grid step
    # s_ref:      (14,)    f32 SMEM params: [w1, b1, b2, w3, b3, w2_00 .. w2_22]
    # o_ref:      (CH, CW) f32 output canvas; valid result lives in [0:H3, 0:W3]
    # canvas_ref: (CH, CW) f32 VMEM scratch for the fused zero-pad
    w1 = s_ref[0]
    b1 = s_ref[1]
    b2 = s_ref[2]
    w3 = s_ref[3]
    b3 = s_ref[4]

    # ---- fused zero-pad: place x directly at its final (2,2) offset in the scratch.
    # Re-zeroed every grid step (cheap; safe under "parallel" megacore splitting).
    canvas_ref[...] = jnp.zeros((CH, CW), jnp.float32)
    canvas_ref[2:2 + H, 2:2 + W] = x_ref[...]
    x = canvas_ref[...]

    # bool footprint mask of the x2/x4 region: rows [1, 1+H2), cols [1, 1+W2).
    ii = lax.broadcasted_iota(jnp.int32, (CH, CW), 0)
    jj = lax.broadcasted_iota(jnp.int32, (CH, CW), 1)
    mask = (ii >= 1) & (ii < 1 + H2) & (jj >= 1) & (jj < 1 + W2)

    # conv1: 1x1, padding=1 -> tanh; zero outside the footprint (== conv2's zero pad).
    x2 = jnp.where(mask, jnp.tanh(w1 * x + b1), 0.0)

    # conv2: 3x3, padding=1 with shared shifts -> 4 XLU rolls total.
    cl = pltpu.roll(x2, 1, axis=1)        # cl[i, j] = x2[i, j-1]   (dj = -1)
    cr = pltpu.roll(x2, CW - 1, axis=1)   # cr[i, j] = x2[i, j+1]   (dj = +1)
    s_top = s_ref[5] * cl + s_ref[6] * x2 + s_ref[7] * cr      # kernel row 0 (di=-1)
    s_mid = s_ref[8] * cl + s_ref[9] * x2 + s_ref[10] * cr     # kernel row 1 (di= 0)
    s_bot = s_ref[11] * cl + s_ref[12] * x2 + s_ref[13] * cr   # kernel row 2 (di=+1)
    acc = (pltpu.roll(s_top, 1, axis=0)          # -> s_top[i-1, j]
           + s_mid
           + pltpu.roll(s_bot, CH - 1, axis=0))  # -> s_bot[i+1, j]

    # tanh, then re-mask (zero ring == conv3's zero padding).
    x4 = jnp.where(mask, jnp.tanh(acc + b2), 0.0)

    # conv3: 1x1, padding=1 -> tanh.  Single lane-dense, unmasked full-canvas store.
    o_ref[...] = jnp.tanh(w3 * x4 + b3)


def _canvas_call(x_planes, scalars):
    """x_planes: (N, H, W) f32, scalars: (14,) f32  ->  (N, CH, CW) f32 canvases."""
    n = x_planes.shape[0]
    return pl.pallas_call(
        _model_tanh_kernel,
        out_shape=jax.ShapeDtypeStruct((n, CH, CW), jnp.float32),
        grid=(n,),
        in_specs=[
            pl.BlockSpec((None, H, W), lambda i: (i, 0, 0)),
            pl.BlockSpec(memory_space=pltpu.MemorySpace.SMEM),
        ],
        out_specs=pl.BlockSpec((None, CH, CW), lambda i: (i, 0, 0)),
        scratch_shapes=[pltpu.VMEM((CH, CW), jnp.float32)],
        compiler_params=pltpu.CompilerParams(
            dimension_semantics=("parallel",)),
        cost_estimate=pl.CostEstimate(
            flops=20 * CH * CW * n,
            transcendentals=3 * CH * CW * n,
            bytes_accessed=4 * (n * H * W + n * CH * CW + 14)),
    )(x_planes.astype(jnp.float32), scalars)


def pack_params(w1, b1, w2, b2, w3, b3):
    """Build the 14-element SMEM parameter vector once (outside the per-call path)."""
    return jnp.concatenate(
        [
            jnp.stack([w1, b1, b2, w3, b3]).astype(jnp.float32),
            jnp.asarray(w2, jnp.float32).reshape(-1),
        ]
    )  # (14,)


@jax.jit
def model_tanh_forward_canvas(x_planes, scalars):
    """Fast path.  x_planes: (N, 49, 89) f32, scalars: (14,) f32.

    Returns (N, 56, 128) canvases; the valid module output is canvas[:, :53, :93].
    (Outside that window the canvas is tanh(b3) -- slice before consuming.)
    """
    return _canvas_call(x_planes, scalars)


@jax.jit
def model_tanh_forward(x_nchw, scalars):
    """PyTorch-shaped API: x_nchw (N, C, 49, 89) -> (N, C, 53, 93)."""
    n, c = x_nchw.shape[0], x_nchw.shape[1]
    planes = x_nchw.reshape(n * c, H, W)
    canvas = _canvas_call(planes, scalars)
    return canvas[:, :H3, :W3].reshape(n, c, H3, W3)


def _reference(x_nchw, w1, b1, w2, b2, w3, b3):
    """Pure-JAX reference using lax.conv (PyTorch conv == cross-correlation)."""
    dn = ("NCHW", "OIHW", "NCHW")

    def conv(x, w, b, k):
        w4 = w.reshape(1, 1, k, k).astype(jnp.float32)
        y = lax.conv_general_dilated(
            x, w4, window_strides=(1, 1), padding=((1, 1), (1, 1)),
            dimension_numbers=dn)
        return y + b

    x1 = conv(x_nchw, jnp.reshape(w1, (1, 1)), b1, 1)
    x2 = jnp.tanh(x1)
    x3 = conv(x2, w2, b2, 3)
    x4 = jnp.tanh(x3)
    x5 = conv(x4, jnp.reshape(w3, (1, 1)), b3, 1)
    return jnp.tanh(x5)


if __name__ == "__main__":
    key = jax.random.PRNGKey(0)
    ks = jax.random.split(key, 7)

    # Deterministic parameter init (PyTorch default: U(-sqrt(1/fan_in), sqrt(1/fan_in)))
    w1 = jax.random.uniform(ks[0], (), jnp.float32, -1.0, 1.0)              # fan_in=1
    b1 = jax.random.uniform(ks[1], (), jnp.float32, -1.0, 1.0)
    w2 = jax.random.uniform(ks[2], (3, 3), jnp.float32, -1.0 / 3, 1.0 / 3)  # fan_in=9
    b2 = jax.random.uniform(ks[3], (), jnp.float32, -1.0 / 3, 1.0 / 3)
    w3 = jax.random.uniform(ks[4], (), jnp.float32, -1.0, 1.0)              # fan_in=1
    b3 = jax.random.uniform(ks[5], (), jnp.float32, -1.0, 1.0)

    x = jax.random.uniform(ks[6], (1, 1, H, W), jnp.float32)

    # Pack the 14 scalar parameters once, outside the per-call path.
    scalars = jax.block_until_ready(pack_params(w1, b1, w2, b2, w3, b3))

    # Fast path: (N, 56, 128) canvases (no host pad, no output slice inside the call).
    canvas = jax.block_until_ready(
        model_tanh_forward_canvas(x.reshape(1, H, W), scalars))
    assert canvas.shape == (1, CH, CW), canvas.shape

    # PyTorch-shaped output.
    out = jax.block_until_ready(model_tanh_forward(x, scalars))
    assert out.shape == (1, 1, H3, W3), out.shape

    ref = jax.block_until_ready(_reference(x, w1, b1, w2, b2, w3, b3))
    err_canvas = float(jnp.max(jnp.abs(canvas[0, :H3, :W3] - ref[0, 0])))
    err_out = float(jnp.max(jnp.abs(out - ref)))
    assert err_canvas < 2e-5, err_canvas
    assert err_out < 2e-5, err_out

    print("KERNEL_OK")
</pallas_src>

<mosaic_0001>
module attributes {stable_mosaic.version = 11 : i64} {
  func.func @_model_tanh_kernel(%arg0: i32, %arg1: memref<1x49x89xf32, #tpu.memory_space<vmem>>, %arg2: memref<14xf32, #tpu.memory_space<smem>>, %arg3: memref<1x56x128xf32, #tpu.memory_space<vmem>>, %arg4: memref<56x128xf32, #tpu.memory_space<vmem>>) attributes {dimension_semantics = [#tpu.dimension_semantics<parallel>], iteration_bounds = array<i64: 1>, scalar_prefetch = 0 : i64, scratch_operands = 1 : i64, tpu.core_type = #tpu.core_type<tc>, window_params = [{transform_indices = @transform_0, window_bounds = array<i64: 1, 49, 89>}, {transform_indices = @transform_1, window_bounds = array<i64: 14>}, {transform_indices = @transform_2, window_bounds = array<i64: 1, 56, 128>}]} {
    %c0 = arith.constant 0 : index
    %0 = memref.load %arg2[%c0] : memref<14xf32, #tpu.memory_space<smem>>
    %c1 = arith.constant 1 : index
    %1 = memref.load %arg2[%c1] : memref<14xf32, #tpu.memory_space<smem>>
    %c2 = arith.constant 2 : index
    %2 = memref.load %arg2[%c2] : memref<14xf32, #tpu.memory_space<smem>>
    %c3 = arith.constant 3 : index
    %3 = memref.load %arg2[%c3] : memref<14xf32, #tpu.memory_space<smem>>
    %c4 = arith.constant 4 : index
    %4 = memref.load %arg2[%c4] : memref<14xf32, #tpu.memory_space<smem>>
    %cst = arith.constant 0.000000e+00 : f32
    %5 = vector.broadcast %cst : f32 to vector<56x128xf32>
    %c0_0 = arith.constant 0 : index
    %c0_1 = arith.constant 0 : index
    %6 = vector.load %arg4[%c0_0, %c0_1] : memref<56x128xf32, #tpu.memory_space<vmem>>, vector<56x128xf32>
    tpu.vector_store %arg4[%c0_0, %c0_1], %5 {strides = array<i32>} : memref<56x128xf32, #tpu.memory_space<vmem>>, vector<56x128xf32>,
    %c0_2 = arith.constant 0 : index
    %c0_3 = arith.constant 0 : index
    %c0_4 = arith.constant 0 : index
    %7 = vector.load %arg1[%c0_2, %c0_3, %c0_4] : memref<1x49x89xf32, #tpu.memory_space<vmem>>, vector<1x49x89xf32>
    %8 = vector.shape_cast %7 : vector<1x49x89xf32> to vector<49x89xf32>
    %c2_5 = arith.constant 2 : index
    %c2_6 = arith.constant 2 : index
    %9 = vector.load %arg4[%c2_5, %c2_6] : memref<56x128xf32, #tpu.memory_space<vmem>>, vector<49x89xf32>
    tpu.vector_store %arg4[%c2_5, %c2_6], %8 {strides = array<i32>} : memref<56x128xf32, #tpu.memory_space<vmem>>, vector<49x89xf32>,
    %c0_7 = arith.constant 0 : index
    %c0_8 = arith.constant 0 : index
    %10 = vector.load %arg4[%c0_7, %c0_8] : memref<56x128xf32, #tpu.memory_space<vmem>>, vector<56x128xf32>
    %11 = tpu.iota {dimensions = array<i32: 0>} : vector<56x128xi32>
    %12 = tpu.iota {dimensions = array<i32: 1>} : vector<56x128xi32>
    %c1_i32 = arith.constant 1 : i32
    %13 = vector.broadcast %c1_i32 : i32 to vector<56x128xi32>
    %14 = arith.cmpi sge, %11, %13 : vector<56x128xi32>
    %c52_i32 = arith.constant 52 : i32
    %15 = vector.broadcast %c52_i32 : i32 to vector<56x128xi32>
    %16 = arith.cmpi slt, %11, %15 : vector<56x128xi32>
    %17 = arith.andi %14, %16 : vector<56x128xi1>
    %c1_i32_9 = arith.constant 1 : i32
    %18 = vector.broadcast %c1_i32_9 : i32 to vector<56x128xi32>
    %19 = arith.cmpi sge, %12, %18 : vector<56x128xi32>
    %20 = arith.andi %17, %19 : vector<56x128xi1>
    %c92_i32 = arith.constant 92 : i32
    %21 = vector.broadcast %c92_i32 : i32 to vector<56x128xi32>
    %22 = arith.cmpi slt, %12, %21 : vector<56x128xi32>
    %23 = arith.andi %20, %22 : vector<56x128xi1>
    %24 = vector.broadcast %0 : f32 to vector<56x128xf32>
    %25 = arith.mulf %24, %10 : vector<56x128xf32>
    %26 = vector.broadcast %1 : f32 to vector<56x128xf32>
    %27 = arith.addf %25, %26 : vector<56x128xf32>
    %28 = math.tanh %27 : vector<56x128xf32>
    %cst_10 = arith.constant 0.000000e+00 : f32
    %29 = vector.broadcast %cst_10 : f32 to vector<56x128xf32>
    %30 = arith.select %23, %28, %29 : vector<56x128xi1>, vector<56x128xf32>
    %c1_i32_11 = arith.constant 1 : i32
    %31 = tpu.dynamic_rotate %30 by %c1_i32_11 dim 1 : vector<56x128xf32>, i32 -> vector<56x128xf32>
    %c127_i32 = arith.constant 127 : i32
    %32 = tpu.dynamic_rotate %30 by %c127_i32 dim 1 : vector<56x128xf32>, i32 -> vector<56x128xf32>
    %c5 = arith.constant 5 : index
    %33 = memref.load %arg2[%c5] : memref<14xf32, #tpu.memory_space<smem>>
    %34 = vector.broadcast %33 : f32 to vector<56x128xf32>
    %35 = arith.mulf %34, %31 : vector<56x128xf32>
    %c6 = arith.constant 6 : index
    %36 = memref.load %arg2[%c6] : memref<14xf32, #tpu.memory_space<smem>>
    %37 = vector.broadcast %36 : f32 to vector<56x128xf32>
    %38 = arith.mulf %37, %30 : vector<56x128xf32>
    %39 = arith.addf %35, %38 : vector<56x128xf32>
    %c7 = arith.constant 7 : index
    %40 = memref.load %arg2[%c7] : memref<14xf32, #tpu.memory_space<smem>>
    %41 = vector.broadcast %40 : f32 to vector<56x128xf32>
    %42 = arith.mulf %41, %32 : vector<56x128xf32>
    %43 = arith.addf %39, %42 : vector<56x128xf32>
    %c8 = arith.constant 8 : index
    %44 = memref.load %arg2[%c8] : memref<14xf32, #tpu.memory_space<smem>>
    %45 = vector.broadcast %44 : f32 to vector<56x128xf32>
    %46 = arith.mulf %45, %31 : vector<56x128xf32>
    %c9 = arith.constant 9 : index
    %47 = memref.load %arg2[%c9] : memref<14xf32, #tpu.memory_space<smem>>
    %48 = vector.broadcast %47 : f32 to vector<56x128xf32>
    %49 = arith.mulf %48, %30 : vector<56x128xf32>
    %50 = arith.addf %46, %49 : vector<56x128xf32>
    %c10 = arith.constant 10 : index
    %51 = memref.load %arg2[%c10] : memref<14xf32, #tpu.memory_space<smem>>
    %52 = vector.broadcast %51 : f32 to vector<56x128xf32>
    %53 = arith.mulf %52, %32 : vector<56x128xf32>
    %54 = arith.addf %50, %53 : vector<56x128xf32>
    %c11 = arith.constant 11 : index
    %55 = memref.load %arg2[%c11] : memref<14xf32, #tpu.memory_space<smem>>
    %56 = vector.broadcast %55 : f32 to vector<56x128xf32>
    %57 = arith.mulf %56, %31 : vector<56x128xf32>
    %c12 = arith.constant 12 : index
    %58 = memref.load %arg2[%c12] : memref<14xf32, #tpu.memory_space<smem>>
    %59 = vector.broadcast %58 : f32 to vector<56x128xf32>
    %60 = arith.mulf %59, %30 : vector<56x128xf32>
    %61 = arith.addf %57, %60 : vector<56x128xf32>
    %c13 = arith.constant 13 : index
    %62 = memref.load %arg2[%c13] : memref<14xf32, #tpu.memory_space<smem>>
    %63 = vector.broadcast %62 : f32 to vector<56x128xf32>
    %64 = arith.mulf %63, %32 : vector<56x128xf32>
    %65 = arith.addf %61, %64 : vector<56x128xf32>
    %c1_i32_12 = arith.constant 1 : i32
    %66 = tpu.dynamic_rotate %43 by %c1_i32_12 dim 0 : vector<56x128xf32>, i32 -> vector<56x128xf32>
    %67 = arith.addf %66, %54 : vector<56x128xf32>
    %c55_i32 = arith.constant 55 : i32
    %68 = tpu.dynamic_rotate %65 by %c55_i32 dim 0 : vector<56x128xf32>, i32 -> vector<56x128xf32>
    %69 = arith.addf %67, %68 : vector<56x128xf32>
    %70 = vector.broadcast %2 : f32 to vector<56x128xf32>
    %71 = arith.addf %69, %70 : vector<56x128xf32>
    %72 = math.tanh %71 : vector<56x128xf32>
    %cst_13 = arith.constant 0.000000e+00 : f32
    %73 = vector.broadcast %cst_13 : f32 to vector<56x128xf32>
    %74 = arith.select %23, %72, %73 : vector<56x128xi1>, vector<56x128xf32>
    %75 = vector.broadcast %3 : f32 to vector<56x128xf32>
    %76 = arith.mulf %75, %74 : vector<56x128xf32>
    %77 = vector.broadcast %4 : f32 to vector<56x128xf32>
    %78 = arith.addf %76, %77 : vector<56x128xf32>
    %79 = math.tanh %78 : vector<56x128xf32>
    %c0_14 = arith.constant 0 : index
    %c0_15 = arith.constant 0 : index
    %c0_16 = arith.constant 0 : index
    %80 = vector.load %arg3[%c0_14, %c0_15, %c0_16] : memref<1x56x128xf32, #tpu.memory_space<vmem>>, vector<1x56x128xf32>
    %81 = vector.shape_cast %80 : vector<1x56x128xf32> to vector<56x128xf32>
    %82 = vector.shape_cast %79 : vector<56x128xf32> to vector<1x56x128xf32>
    tpu.vector_store %arg3[%c0_14, %c0_15, %c0_16], %82 {strides = array<i32>} : memref<1x56x128xf32, #tpu.memory_space<vmem>>, vector<1x56x128xf32>,
    return
  }
  func.func @transform_0(%arg0: i32) -> (i32, i32, i32) {
    %c0_i32 = arith.constant 0 : i32
    %c0_i32_0 = arith.constant 0 : i32
    %c0_i32_1 = arith.constant 0 : i32
    return %arg0, %c0_i32, %c0_i32_0 : i32, i32, i32
  }
  func.func @transform_1(%arg0: i32) -> i32 {
    %c0_i32 = arith.constant 0 : i32
    %c0_i32_0 = arith.constant 0 : i32
    return %c0_i32 : i32
  }
  func.func @transform_2(%arg0: i32) -> (i32, i32, i32) {
    %c0_i32 = arith.constant 0 : i32
    %c0_i32_0 = arith.constant 0 : i32
    %c0_i32_1 = arith.constant 0 : i32
    return %arg0, %c0_i32, %c0_i32_0 : i32, i32, i32
  }
}

</mosaic_0001>

<bundles_post_ra>
// kernel: model_tanh_forward_canvas.1
= control target key start
LH: loop header
LB: loop body
LE: loop exit
PB: predicated region body
PF: predicated region fallthrough
CT: control target
= control target key end

     0   :  { %7 = vsyncpa [#allocation5], 0  ;;  %s859_s0 = inlined_call_operand.vmem [shape: f32[1,49,89], index: 0, kind: input, shape index: {}]   ;;  %s860_s1 = inlined_call_operand.vmem [shape: f32[14], index: 1, kind: input, shape index: {}]   ;;  %s861_s2 = inlined_call_operand.hbm [shape: f32[1,56,128], index: 2, kind: output, shape index: {}]  }
   0x1   :  { %8 = vsyncpa [#allocation4], 0  ;;  %s16_s11 = sshll.u32 %s860_s1, 4  ;;  %s534_s12 = smov [#allocation3]   ;;  %s17_s11 = int_to_ptr.vmem [resolvable:$true] %s16_s11 }
   0x2   :  { %19 = dma.vmem_to_smem %s17_s11, 16, %s534_s12, [#allocation5]  }
   0x3   :  { %530 = dma.done.wait [#allocation5], 16  }
   0x4   :  { %531 = vsyncadd [#allocation5], 4294967280 }
   0x5   :  { %24 = sfence }
   0x6   :  { %v39_v0 = vld [vmem:[%s859_s0 + $0x10] sm:$0xff]  ;;  %v37_v1 = vld [vmem:[%s859_s0] sm:$0xff]  ;;  %s535_s17 = smov 2   ;;  %v40_v3 = vld [vmem:[%s859_s0 + $0x18] sm:$0xff]  ;;  %v536_v7 = vmov 0.0   ;;  %vm72_vm0 = vcmask 744464   ;;  %v88_v12 = vlaneseq }
   0x7   :  { %55 = vrot.lane.b32.xlu1 %v39_v0, %s535_s17  ;;  %51 = vrot.lane.b32.xlu0 %v37_v1, %s535_s17  ;;  %v41_v2 = vld [vmem:[%s859_s0 + $0x20] sm:$0xff]  ;;  %v38_v4 = vld [vmem:[%s859_s0 + $0x8] sm:$0xff]  ;;  %34 = vst [vmem:[#allocation2 + $0x20] sm:$0xff] %v536_v7  ;;  %s25_s27 = sld [smem:[#allocation3]]  ;;  %vm79_vm3 = vcmask 737296   ;;  %s537_s28 = smov 1  }
   0x8   :  { %59 = vrot.lane.b32.xlu2 %v41_v2, %s535_s17  ;;  %v42_v5 = vld [vmem:[%s859_s0 + $0x28] sm:$0xff]  ;;  %v43_v6 = vld [vmem:[%s859_s0 + $0x30] sm:$0x1]  ;;  %35 = vst [vmem:[#allocation2 + $0x28] sm:$0xff] %v536_v7  ;;  %s431_s0 = sld [smem:[#allocation3 + $0x1]]  ;;  %v585_v16 = vshrl.u32 %v88_v12, 7 }
   0x9   :  { %30 = vst [vmem:[#allocation2] sm:$0xff] %v536_v7  ;;  %v97_v17 = vand.u32 127, %v88_v12  ;;  %s538_s29 = smov 127   ;;  %s436_s30 = sld [smem:[#allocation3 + $0x6]] }
   0xa   :  { %31 = vst [vmem:[#allocation2 + $0x8] sm:$0xff] %v536_v7  ;;  %vm98_vm1 = vcmp.ge.s32.totalorder %v585_v16, 1  ;;  %v95_v40 = vadd.s32 48, %v585_v16  ;;  %s439_s3 = sld [smem:[#allocation3 + $0x9]]  ;;  %vm323_vm11 = vcmp.lt.s32.totalorder %v585_v16, 1  ;;  %vm345_vm12 = vcmp.lt.s32.totalorder %v585_v16, 7 }
   0xb   :  { %32 = vst [vmem:[#allocation2 + $0x10] sm:$0xff] %v536_v7  ;;  %vm119_vm2 = vcmp.ge.s32.totalorder %v97_v17, 1  ;;  %vm127_vm5 = vcmp.lt.s32.totalorder %v97_v17, 92  ;;  %s442_s4 = sld [smem:[#allocation3 + $0xc]]  ;;  %s539_s14 = smov [#allocation6]  }
   0xc   :  { %33 = vst [vmem:[#allocation2 + $0x18] sm:$0xff] %v536_v7  ;;  %vm120_vm4 = vmand %vm98_vm1, %vm119_vm2  ;;  %vm111_vm8 = vcmp.lt.s32.totalorder %v95_v40, 52  ;;  %s435_s5 = sld [smem:[#allocation3 + $0x5]]  ;;  %s416_s15 = sshll.u32 %s539_s14, 4  ;;  %s417_s15 = int_to_ptr.vmem [resolvable:$true] %s416_s15 }
   0xd   :  { %36 = vst [vmem:[#allocation2 + $0x30] sm:$0xff] %v536_v7  ;;  %v135_v13 = vstv %s25_s27  ;;  %vm592_vm6 = vmand %vm120_vm4, %vm127_vm5  ;;  %s438_s6 = sld [smem:[#allocation3 + $0x8]]  ;;  %s418_s18 = sshll.u32 %s861_s2, 4  ;;  %s419_s18 = int_to_ptr.hbm [resolvable:$true] %s418_s18 }
   0xe   :  { %v143_v19 = vstv %s431_s0  ;;  %vm605_vm7 = vmand %vm119_vm2, %vm127_vm5  ;;  %s441_s7 = sld [smem:[#allocation3 + $0xb]]  ;;  %s540_s19 = smov 128  }
   0xf   :  { %57 = vrot.lane.b32.xlu1 %v40_v3, %s535_s17  ;;  %53 = vrot.lane.b32.xlu0 %v38_v4, %s535_s17  ;;  %vm126_vm9 = vmand %vm111_vm8, %vm119_vm2  ;;  %v203_v62 = vstv %s436_s30  ;;  %s644_s8 = sld [smem:[#allocation3 + $0x7]]  ;;  %s541_s1 = smov 8  }
  0x10   :  { %61 = vrot.lane.b32.xlu2 %v42_v5, %s535_s17  ;;  %vm623_vm10 = vmand %vm126_vm9, %vm127_vm5  ;;  %v244_v0 = vstv %s439_s3  ;;  %s646_s9 = sld [smem:[#allocation3 + $0xd]] }
  0x11   :  { %v285_v1 = vstv %s442_s4  ;;  %s655_s10 = sld [smem:[#allocation3 + $0xa]] }
  0x12   :  { %s675_s11 = sld [smem:[#allocation3 + $0x2]] }
  0x13   :  { %s681_s12 = sld [smem:[#allocation3 + $0x3]] }
  0x14   :  { %s797_s13 = sld [smem:[#allocation3 + $0x4]] }
  0x16   :  { %v697_v40 = vstv %s646_s9 }
  0x17   :  { %63 = vrot.lane.b32.xlu0 %v43_v6, %s535_s17 }
  0x62   :  { %v60_v8 = vpop.permute.xlu2 %59 }
  0x63   :  { %77 = vst.msk [vmem:[#allocation2 + $0x22] sm:$0xff] %vm72_vm0, %v60_v8 }
  0x6a   :  { %v62_v9 = vpop.permute.xlu2 %61 }
  0x6b   :  { %78 = vst.msk [vmem:[#allocation2 + $0x2a] sm:$0xff] %vm72_vm0, %v62_v9 }
  0x72   :  { %v86_v24 = vld [vmem:[#allocation2 + $0x28] sm:$0xff] }
  0x73   :  { %v141_v33 = vmul.f32 %v135_v13, %v86_v24 }
  0x75   :  { %v149_v39 = vadd.f32 %v143_v19, %v141_v33 }
  0x79   :  { %v56_v10 = vpop.permute.xlu1 %55  ;;  %v52_v11 = vpop.permute.xlu0 %51 }
  0x7a   :  { %75 = vst.msk [vmem:[#allocation2 + $0x12] sm:$0xff] %vm72_vm0, %v56_v10  ;;  %v663_v10 = vstv %s435_s5 }
  0x7b   :  { %73 = vst.msk [vmem:[#allocation2 + $0x2] sm:$0xff] %vm72_vm0, %v52_v11 }
  0x81   :  { %v58_v14 = vpop.permute.xlu1 %57  ;;  %v54_v15 = vpop.permute.xlu0 %53 }
  0x82   :  { %76 = vst.msk [vmem:[#allocation2 + $0x1a] sm:$0xff] %vm72_vm0, %v58_v14  ;;  %v81_v18 = vld [vmem:[#allocation2] sm:$0xff]  ;;  %v671_v14 = vstv %s438_s6 }
  0x83   :  { %74 = vst.msk [vmem:[#allocation2 + $0xa] sm:$0xff] %vm72_vm0, %v54_v15  ;;  %v136_v20 = vmul.f32 %v135_v13, %v81_v18  ;;  %v673_v15 = vstv %s441_s7 }
  0x85   :  { %v144_v21 = vadd.f32 %v143_v19, %v136_v20 }
  0x87   :  { %452 = vtanh.f32 %v144_v21 }
  0x89   :  { %v64_v22 = vpop.permute.xlu0 %63  ;;  %v84_v23 = vld [vmem:[#allocation2 + $0x18] sm:$0xff]  ;;  %v85_v28 = vld [vmem:[#allocation2 + $0x20] sm:$0xff] }
  0x8a   :  { %80 = vst.msk [vmem:[#allocation2 + $0x32] sm:$0x1] %vm79_vm3, %v64_v22  ;;  %v83_v25 = vld [vmem:[#allocation2 + $0x10] sm:$0xff]  ;;  %v82_v26 = vld [vmem:[#allocation2 + $0x8] sm:$0xff]  ;;  %v139_v27 = vmul.f32 %v135_v13, %v84_v23  ;;  %v140_v37 = vmul.f32 %v135_v13, %v85_v28 }
  0x8b   :  { %v138_v30 = vmul.f32 %v135_v13, %v83_v25  ;;  %v137_v31 = vmul.f32 %v135_v13, %v82_v26 }
  0x8c   :  { %v147_v32 = vadd.f32 %v143_v19, %v139_v27  ;;  %v148_v41 = vadd.f32 %v143_v19, %v140_v37 }
  0x8d   :  { %v453_v34 = vpop.eup %452  ;;  %v146_v35 = vadd.f32 %v143_v19, %v138_v30  ;;  %v145_v36 = vadd.f32 %v143_v19, %v137_v31 }
  0x8e   :  { %v598_v38 = vsel %vm592_vm6, %v453_v34, 0.0  ;;  %454 = vtanh.f32 %v147_v32 }
  0x8f   :  { %165 = vrot.lane.b32.xlu1 %v598_v38, %s537_s28  ;;  %456 = vtanh.f32 %v146_v35  ;;  %v204_v2 = vmul.f32 %v203_v62, %v598_v38  ;;  %v245_v6 = vmul.f32 %v244_v0, %v598_v38  ;;  %v286_v7 = vmul.f32 %v285_v1, %v598_v38 }
  0x90   :  { %458 = vtanh.f32 %v145_v36 }
  0x91   :  { %v87_v42 = vld [vmem:[#allocation2 + $0x30] sm:$0xff]  ;;  %460 = vtanh.f32 %v149_v39  ;;  %v694_v39 = vstv %s644_s8 }
  0x92   :  { %v142_v44 = vmul.f32 %v135_v13, %v87_v42  ;;  %462 = vtanh.f32 %v148_v41 }
  0x94   :  { %v455_v45 = vpop.eup %454  ;;  %v150_v46 = vadd.f32 %v143_v19, %v142_v44 }
  0x95   :  { %v457_v47 = vpop.eup %456  ;;  %v611_v48 = vsel %vm605_vm7, %v455_v45, 0.0  ;;  %v704_v45 = vstv %s655_s10 }
  0x96   :  { %v459_v49 = vpop.eup %458  ;;  %v160_v50 = vsel %vm605_vm7, %v457_v47, 0.0  ;;  %464 = vtanh.f32 %v150_v46  ;;  %v207_v8 = vmul.f32 %v203_v62, %v611_v48  ;;  %v661_v9 = vmul.f32 %v244_v0, %v611_v48 }
  0x97   :  { %169 = vrot.lane.b32.xlu0 %v160_v50, %s537_s28  ;;  %v159_v51 = vsel %vm605_vm7, %v459_v49, 0.0  ;;  %171 = vrot.lane.b32.xlu1 %v611_v48, %s537_s28  ;;  %v461_v52 = vpop.eup %460  ;;  %v665_v11 = vmul.f32 %v203_v62, %v160_v50  ;;  %v667_v12 = vmul.f32 %v244_v0, %v160_v50  ;;  %v669_v13 = vmul.f32 %v285_v1, %v160_v50 }
  0x98   :  { %167 = vrot.lane.b32.xlu2 %v159_v51, %s537_s28  ;;  %v463_v54 = vpop.eup %462  ;;  %v163_v57 = vsel %vm605_vm7, %v461_v52, 0.0  ;;  %v205_v17 = vmul.f32 %v203_v62, %v159_v51  ;;  %v246_v18 = vmul.f32 %v244_v0, %v159_v51  ;;  %v287_v19 = vmul.f32 %v285_v1, %v159_v51 }
  0x99   :  { %v162_v58 = vsel %vm605_vm7, %v463_v54, 0.0  ;;  %v649_v3 = vmul.f32 %v203_v62, %v163_v57  ;;  %v651_v4 = vmul.f32 %v244_v0, %v163_v57  ;;  %v653_v5 = vmul.f32 %v285_v1, %v163_v57 }
  0x9a   :  { %v208_v20 = vmul.f32 %v203_v62, %v162_v58  ;;  %v249_v21 = vmul.f32 %v244_v0, %v162_v58  ;;  %v290_v22 = vmul.f32 %v285_v1, %v162_v58  ;;  %v289_v30 = vmul.f32 %v285_v1, %v611_v48 }
  0x9c   :  { %v465_v55 = vpop.eup %464 }
  0x9d   :  { %v629_v56 = vsel %vm623_vm10, %v465_v55, 0.0 }
  0x9e   :  { %v210_v36 = vmul.f32 %v203_v62, %v629_v56  ;;  %v690_v37 = vmul.f32 %v244_v0, %v629_v56  ;;  %v722_v62 = vstv %s675_s11 }
  0x9f   :  { %175 = vrot.lane.b32.xlu0 %v163_v57, %s537_s28  ;;  %177 = vrot.lane.b32.xlu1 %v629_v56, %s537_s28 }
  0xa0   :  { %173 = vrot.lane.b32.xlu2 %v162_v58, %s537_s28 }
  0xa7   :  { %181 = vrot.lane.b32.xlu0 %v159_v51, %s538_s29  ;;  %183 = vrot.lane.b32.xlu1 %v160_v50, %s538_s29 }
  0xa8   :  { %179 = vrot.lane.b32.xlu2 %v598_v38, %s538_s29  ;;  %v292_v38 = vmul.f32 %v285_v1, %v629_v56 }
  0xaf   :  { %187 = vrot.lane.b32.xlu0 %v162_v58, %s538_s29  ;;  %189 = vrot.lane.b32.xlu1 %v163_v57, %s538_s29 }
  0xb0   :  { %185 = vrot.lane.b32.xlu2 %v611_v48, %s538_s29 }
  0xb8   :  { %191 = vrot.lane.b32.xlu2 %v629_v56, %s538_s29 }
  0xf2   :  { %v168_v59 = vpop.permute.xlu2 %167 }
  0xf3   :  { %v196_v25 = vmul.f32 %v663_v10, %v168_v59  ;;  %v237_v31 = vmul.f32 %v671_v14, %v168_v59  ;;  %v278_v32 = vmul.f32 %v673_v15, %v168_v59 }
  0xf5   :  { %v701_v44 = vadd.f32 %v205_v17, %v196_v25  ;;  %v707_v48 = vadd.f32 %v246_v18, %v237_v31  ;;  %v294_v49 = vadd.f32 %v287_v19, %v278_v32  ;;  %v727_v17 = vstv %s681_s12 }
  0xfa   :  { %v174_v60 = vpop.permute.xlu2 %173 }
  0xfb   :  { %v199_v33 = vmul.f32 %v663_v10, %v174_v60  ;;  %v240_v34 = vmul.f32 %v671_v14, %v174_v60  ;;  %v281_v35 = vmul.f32 %v673_v15, %v174_v60 }
  0xfd   :  { %v709_v50 = vadd.f32 %v208_v20, %v199_v33  ;;  %v711_v51 = vadd.f32 %v249_v21, %v240_v34  ;;  %v713_v52 = vadd.f32 %v290_v22, %v281_v35 }
 0x101   :  { %v166_v61 = vpop.permute.xlu1 %165 }
 0x102   :  { %v642_v63 = vpop.permute.xlu2 %179  ;;  %v195_v26 = vmul.f32 %v663_v10, %v166_v61  ;;  %v277_v27 = vmul.f32 %v673_v15, %v166_v61  ;;  %v236_v41 = vmul.f32 %v671_v14, %v166_v61 }
 0x103   :  { %v220_v54 = vmul.f32 %v694_v39, %v642_v63  ;;  %v302_v55 = vmul.f32 %v697_v40, %v642_v63  ;;  %v261_v18 = vmul.f32 %v704_v45, %v642_v63 }
 0x104   :  { %v211_v46 = vadd.f32 %v204_v2, %v195_v26  ;;  %v293_v47 = vadd.f32 %v286_v7, %v277_v27  ;;  %v252_v57 = vadd.f32 %v245_v6, %v236_v41 }
 0x106   :  { %v227_v0 = vadd.f32 %v220_v54, %v211_v46  ;;  %v309_v1 = vadd.f32 %v302_v55, %v293_v47  ;;  %v268_v25 = vadd.f32 %v261_v18, %v252_v57 }
 0x108   :  { %v316_v63 = vrot.slane %v227_v0, 7  ;;  %v338_v32 = vrot.slane %v309_v1, 1 }
 0x109   :  { %v170_v23 = vpop.permute.xlu0 %169  ;;  %v172_v24 = vpop.permute.xlu1 %171 }
 0x10a   :  { %v186_v28 = vpop.permute.xlu2 %185  ;;  %v198_v42 = vmul.f32 %v663_v10, %v172_v24  ;;  %v239_v56 = vmul.f32 %v671_v14, %v172_v24  ;;  %v280_v59 = vmul.f32 %v673_v15, %v172_v24  ;;  %v197_v6 = vmul.f32 %v663_v10, %v170_v23 }
 0x10b   :  { %v223_v19 = vmul.f32 %v694_v39, %v186_v28  ;;  %v279_v20 = vmul.f32 %v673_v15, %v170_v23  ;;  %v264_v33 = vmul.f32 %v704_v45, %v186_v28 }
 0x10c   :  { %v214_v58 = vadd.f32 %v207_v8, %v198_v42  ;;  %v238_v8 = vmul.f32 %v671_v14, %v170_v23  ;;  %v255_v21 = vadd.f32 %v661_v9, %v239_v56  ;;  %v296_v27 = vadd.f32 %v289_v30, %v280_v59 }
 0x10d   :  { %v213_v35 = vadd.f32 %v665_v11, %v197_v6  ;;  %v305_v23 = vmul.f32 %v697_v40, %v186_v28  ;;  %v295_v42 = vadd.f32 %v669_v13, %v279_v20 }
 0x10e   :  { %v737_v26 = vadd.f32 %v223_v19, %v214_v58  ;;  %v271_v30 = vadd.f32 %v264_v33, %v255_v21 }
 0x10f   :  { %v749_v47 = vadd.f32 %v305_v23, %v296_v27 }
 0x110   :  { %v319_v54 = vrot.slane %v737_v26, 7 }
 0x111   :  { %v176_v60 = vpop.permute.xlu0 %175  ;;  %v178_v61 = vpop.permute.xlu1 %177 }
 0x112   :  { %v192_v2 = vpop.permute.xlu2 %191  ;;  %v201_v7 = vmul.f32 %v663_v10, %v178_v61  ;;  %v283_v31 = vmul.f32 %v673_v15, %v178_v61  ;;  %v200_v55 = vmul.f32 %v663_v10, %v176_v60  ;;  %v241_v57 = vmul.f32 %v671_v14, %v176_v60 }
 0x113   :  { %v226_v22 = vmul.f32 %v694_v39, %v192_v2  ;;  %v308_v9 = vmul.f32 %v697_v40, %v192_v2  ;;  %v282_v19 = vmul.f32 %v673_v15, %v176_v60  ;;  %v242_v27 = vmul.f32 %v671_v14, %v178_v61 }
 0x114   :  { %v217_v24 = vadd.f32 %v210_v36, %v201_v7  ;;  %v299_v41 = vadd.f32 %v292_v38, %v283_v31  ;;  %v254_v36 = vadd.f32 %v667_v12, %v238_v8  ;;  %v341_v8 = vrot.slane %v749_v47, 1 }
 0x116   :  { %v741_v34 = vadd.f32 %v226_v22, %v217_v24  ;;  %v753_v56 = vadd.f32 %v308_v9, %v299_v41  ;;  %v267_v22 = vmul.f32 %v704_v45, %v192_v2 }
 0x118   :  { %v322_v46 = vrot.slane %v741_v34, 7  ;;  %v344_v58 = vrot.slane %v753_v56, 1 }
 0x119   :  { %v182_v11 = vpop.permute.xlu0 %181  ;;  %v184_v28 = vpop.permute.xlu1 %183 }
 0x11a   :  { %v330_v12 = vsel %vm323_vm11, %v322_v46, %v316_v63  ;;  %v221_v13 = vmul.f32 %v694_v39, %v182_v11  ;;  %v303_v38 = vmul.f32 %v697_v40, %v182_v11  ;;  %v262_v59 = vmul.f32 %v704_v45, %v182_v11 }
 0x11b   :  { %v331_v10 = vadd.f32 %v330_v12, %v268_v25  ;;  %v222_v0 = vmul.f32 %v694_v39, %v184_v28  ;;  %v263_v18 = vmul.f32 %v704_v45, %v184_v28  ;;  %v304_v6 = vmul.f32 %v697_v40, %v184_v28 }
 0x11c   :  { %v228_v1 = vadd.f32 %v221_v13, %v701_v44  ;;  %v310_v7 = vadd.f32 %v303_v38, %v294_v49  ;;  %v774_v20 = vsel %vm345_vm12, %v344_v58, %v338_v32  ;;  %v216_v25 = vadd.f32 %v649_v3, %v200_v55 }
 0x11d   :  { %v229_v21 = vadd.f32 %v222_v0, %v213_v35  ;;  %v311_v49 = vadd.f32 %v304_v6, %v295_v42  ;;  %v269_v31 = vadd.f32 %v262_v59, %v707_v48  ;;  %v270_v23 = vadd.f32 %v263_v18, %v254_v36 }
 0x11e   :  { %v317_v24 = vrot.slane %v228_v1, 7  ;;  %v339_v44 = vrot.slane %v310_v7, 1  ;;  %v258_v36 = vadd.f32 %v690_v37, %v242_v27  ;;  %v298_v18 = vadd.f32 %v653_v5, %v282_v19 }
 0x11f   :  { %v318_v33 = vrot.slane %v229_v21, 7  ;;  %v340_v35 = vrot.slane %v311_v49, 1 }
 0x120   :  { %v329_v15 = vsel %vm323_vm11, %v316_v63, %v317_v24  ;;  %v351_v60 = vsel %vm345_vm12, %v338_v32, %v339_v44 }
 0x121   :  { %v332_v9 = vadd.f32 %v329_v15, %v269_v31  ;;  %v353_v2 = vadd.f32 %v351_v60, %v331_v10  ;;  %v327_v3 = vsel %vm323_vm11, %v318_v33, %v319_v54  ;;  %v328_v14 = vsel %vm323_vm11, %v317_v24, %v318_v33  ;;  %v188_v48 = vpop.permute.xlu0 %187  ;;  %v190_v61 = vpop.permute.xlu1 %189 }
 0x122   :  { %v333_v41 = vadd.f32 %v328_v14, %v270_v23  ;;  %v334_v42 = vadd.f32 %v327_v3, %v271_v30  ;;  %v349_v63 = vsel %vm345_vm12, %v340_v35, %v341_v8  ;;  %v350_v32 = vsel %vm345_vm12, %v339_v44, %v340_v35 }
 0x123   :  { %v361_v47 = vadd.f32 %v722_v62, %v353_v2  ;;  %v354_v55 = vadd.f32 %v350_v32, %v332_v9  ;;  %v224_v11 = vmul.f32 %v694_v39, %v188_v48  ;;  %v265_v12 = vmul.f32 %v704_v45, %v188_v48 }
 0x124   :  { %v355_v28 = vadd.f32 %v349_v63, %v333_v41  ;;  %v306_v30 = vmul.f32 %v697_v40, %v188_v48  ;;  %v225_v13 = vmul.f32 %v694_v39, %v190_v61  ;;  %v266_v37 = vmul.f32 %v704_v45, %v190_v61 }
 0x125   :  { %466 = vtanh.f32 %v361_v47  ;;  %v362_v38 = vadd.f32 %v722_v62, %v354_v55  ;;  %v231_v59 = vadd.f32 %v224_v11, %v709_v50  ;;  %v257_v10 = vadd.f32 %v651_v4, %v241_v57 }
 0x126   :  { %v363_v0 = vadd.f32 %v722_v62, %v355_v28  ;;  %v313_v1 = vadd.f32 %v306_v30, %v713_v52  ;;  %v232_v7 = vadd.f32 %v225_v13, %v216_v25  ;;  %v307_v39 = vmul.f32 %v697_v40, %v190_v61 }
 0x127   :  { %468 = vtanh.f32 %v362_v38  ;;  %v320_v6 = vrot.slane %v231_v59, 7  ;;  %v272_v21 = vadd.f32 %v265_v12, %v711_v51  ;;  %v274_v45 = vadd.f32 %v267_v22, %v258_v36 }
 0x128   :  { %470 = vtanh.f32 %v363_v0  ;;  %v342_v50 = vrot.slane %v313_v1, 1  ;;  %v321_v24 = vrot.slane %v232_v7, 7  ;;  %v273_v52 = vadd.f32 %v266_v37, %v257_v10 }
 0x129   :  { %v326_v4 = vsel %vm323_vm11, %v319_v54, %v320_v6  ;;  %v314_v57 = vadd.f32 %v307_v39, %v298_v18  ;;  %v390_v54 = vstv %s797_s13 }
 0x12a   :  { %v335_v44 = vadd.f32 %v326_v4, %v272_v21  ;;  %v348_v5 = vsel %vm345_vm12, %v341_v8, %v342_v50  ;;  %v324_v40 = vsel %vm323_vm11, %v321_v24, %v322_v46  ;;  %v325_v51 = vsel %vm323_vm11, %v320_v6, %v321_v24 }
 0x12b   :  { %v467_v19 = vpop.eup %466  ;;  %v356_v22 = vadd.f32 %v348_v5, %v334_v42  ;;  %v336_v26 = vadd.f32 %v325_v51, %v273_v52  ;;  %v337_v49 = vadd.f32 %v324_v40, %v274_v45  ;;  %v343_v25 = vrot.slane %v314_v57, 1 }
 0x12c   :  { %v375_v27 = vsel %vm592_vm6, %v467_v19, 0.0 }
 0x12d   :  { %v469_v31 = vpop.eup %468  ;;  %v383_v8 = vmul.f32 %v727_v17, %v375_v27  ;;  %v364_v34 = vadd.f32 %v722_v62, %v356_v22  ;;  %v346_v46 = vsel %vm345_vm12, %v343_v25, %v344_v58  ;;  %v347_v33 = vsel %vm345_vm12, %v342_v50, %v343_v25 }
 0x12e   :  { %v471_v15 = vpop.eup %470  ;;  %v376_v60 = vsel %vm605_vm7, %v469_v31, 0.0  ;;  %v357_v23 = vadd.f32 %v347_v33, %v335_v44  ;;  %v358_v29 = vadd.f32 %v346_v46, %v336_v26  ;;  %v359_v35 = vadd.f32 %v774_v20, %v337_v49 }
 0x12f   :  { %v391_v9 = vadd.f32 %v390_v54, %v383_v8  ;;  %v377_v2 = vsel %vm605_vm7, %v471_v15, 0.0  ;;  %v384_v56 = vmul.f32 %v727_v17, %v376_v60  ;;  %472 = vtanh.f32 %v364_v34 }
 0x130   :  { %v385_v58 = vmul.f32 %v727_v17, %v377_v2  ;;  %v365_v16 = vadd.f32 %v722_v62, %v357_v23  ;;  %v366_v14 = vadd.f32 %v722_v62, %v358_v29  ;;  %v367_v61 = vadd.f32 %v722_v62, %v359_v35 }
 0x131   :  { %474 = vtanh.f32 %v391_v9  ;;  %v392_v3 = vadd.f32 %v390_v54, %v384_v56 }
 0x132   :  { %v393_v48 = vadd.f32 %v390_v54, %v385_v58  ;;  %476 = vtanh.f32 %v365_v16 }
 0x133   :  { %478 = vtanh.f32 %v392_v3 }
 0x134   :  { %480 = vtanh.f32 %v393_v48 }
 0x135   :  { %v473_v20 = vpop.eup %472  ;;  %482 = vtanh.f32 %v366_v14 }
 0x136   :  { %v378_v41 = vsel %vm605_vm7, %v473_v20, 0.0  ;;  %484 = vtanh.f32 %v367_v61 }
 0x137   :  { %v475_v42 = vpop.eup %474  ;;  %v386_v63 = vmul.f32 %v727_v17, %v378_v41 }
 0x138   :  { %v477_v32 = vpop.eup %476  ;;  %405 = vst [vmem:[#allocation6] sm:$0xff] %v475_v42 }
 0x139   :  { %v479_v36 = vpop.eup %478  ;;  %v394_v47 = vadd.f32 %v390_v54, %v386_v63  ;;  %v379_v55 = vsel %vm605_vm7, %v477_v32, 0.0 }
 0x13a   :  { %v481_v62 = vpop.eup %480  ;;  %406 = vst [vmem:[#allocation6 + $0x8] sm:$0xff] %v479_v36  ;;  %v387_v11 = vmul.f32 %v727_v17, %v379_v55 }
 0x13b   :  { %v483_v28 = vpop.eup %482  ;;  %407 = vst [vmem:[#allocation6 + $0x10] sm:$0xff] %v481_v62  ;;  %486 = vtanh.f32 %v394_v47 }
 0x13c   :  { %v485_v12 = vpop.eup %484  ;;  %v380_v30 = vsel %vm605_vm7, %v483_v28, 0.0  ;;  %v395_v13 = vadd.f32 %v390_v54, %v387_v11 }
 0x13d   :  { %v381_v38 = vsel %vm623_vm10, %v485_v12, 0.0  ;;  %v388_v59 = vmul.f32 %v727_v17, %v380_v30 }
 0x13e   :  { %v389_v37 = vmul.f32 %v727_v17, %v381_v38  ;;  %488 = vtanh.f32 %v395_v13 }
 0x13f   :  { %v396_v10 = vadd.f32 %v390_v54, %v388_v59 }
 0x140   :  { %v397_v0 = vadd.f32 %v390_v54, %v389_v37 }
 0x141   :  { %v487_v1 = vpop.eup %486  ;;  %490 = vtanh.f32 %v396_v10 }
 0x142   :  { %408 = vst [vmem:[#allocation6 + $0x18] sm:$0xff] %v487_v1  ;;  %492 = vtanh.f32 %v397_v0 }
 0x144   :  { %v489_v43 = vpop.eup %488 }
 0x145   :  { %409 = vst [vmem:[#allocation6 + $0x20] sm:$0xff] %v489_v43 }
 0x147   :  { %v491_v53 = vpop.eup %490 }
 0x148   :  { %v493_v7 = vpop.eup %492  ;;  %410 = vst [vmem:[#allocation6 + $0x28] sm:$0xff] %v491_v53 }
 0x149   :  { %411 = vst [vmem:[#allocation6 + $0x30] sm:$0xff] %v493_v7 }
 0x14a   :  { %424 = dma.vmem_to_hbm [thread:$0]  %s417_s15, 896, %s419_s18, [#allocation4], %s540_s19, %s540_s19, %s541_s1  }
 0x14b   :  { %532 = dma.done.wait [#allocation4], 896  }
 0x14c   :  { %533 = vsyncadd [#allocation4], 4294966400 }
 0x14d   :  { %429 = vsyncpa [#allocation4], 1 }
 0x14e   :  { %430 = vsyncpa [#allocation5], 1 }

</bundles_post_ra>
